<compile_context>
chip_gen: v6e
topology: v6e:2x2x1
jax: 0.10.0
libtpu: 0.0.40
codegen_flags: <defaults>
</compile_context>

<pallas_src>
import functools
import math

import jax
import jax.numpy as jnp
from jax import lax
from jax.experimental import pallas as pl
from jax.experimental.pallas import tpu as pltpu


_LANES = 128
_DEFAULT_BLOCK_ROWS = 4096   # rows (x128 lanes) per grid step; multiple of 8.

# Zero-contribution padding: logsig(1e4) == 0 exactly in f32 (exp(-1e4)
# underflows to 0), and (1 - 1.0) == 0, so the padded term is exactly 0.
_PAD_LOGIT = 1e4
_PAD_LEVEL = 1.0


def _log_sigmoid(x):
    # Numerically stable log(sigmoid(x)) = min(x, 0) - log1p(exp(-|x|)).
    return jnp.minimum(x, 0.0) - jnp.log1p(jnp.exp(-jnp.abs(x)))


def _coral_term(x, lv):
    # == log_sigmoid(x)*lv + (log_sigmoid(x) - x)*(1 - lv), one mul less.
    return _log_sigmoid(x) - x * (1.0 - lv)


# ---------------------------------------------------------------------------
# Kernels
# ---------------------------------------------------------------------------
def _flat_partial_kernel(*refs, rows, tile_rows, need_mask, has_w):
    """Lane-dense scalar reduction: one (8, 128) partial sum per grid step."""
    if has_w:
        x_ref, lv_ref, w_ref, out_ref = refs
    else:
        x_ref, lv_ref, out_ref = refs
        w_ref = None

    x = x_ref[...].astype(jnp.float32)
    lv = lv_ref[...].astype(jnp.float32)
    term = _coral_term(x, lv)
    if w_ref is not None:
        term = term * w_ref[...].astype(jnp.float32)

    def _write(t):
        # (tile_rows, 128) -> (tile_rows//8, 8, 128) -> (8, 128): pure vreg
        # VALU adds, no cross-lane reduce, dense unmasked store.
        out_ref[...] = jnp.sum(t.reshape(-1, 8, _LANES), axis=0)

    if need_mask:   # static flag: only the last tile can have OOB rows
        i = pl.program_id(0)
        is_last = i == pl.num_programs(0) - 1

        @pl.when(is_last)
        def _masked():
            row = lax.broadcasted_iota(jnp.int32, term.shape, 0) + i * tile_rows
            _write(jnp.where(row < rows, term, 0.0))

        @pl.when(jnp.logical_not(is_last))
        def _unmasked():
            _write(term)
    else:
        _write(term)


def _rowloss_kernel(*refs, has_w):
    """reduction=None on transposed (K, N) inputs: lane-dense per-row losses."""
    if has_w:
        x_ref, lv_ref, w_ref, out_ref = refs
    else:
        x_ref, lv_ref, out_ref = refs
        w_ref = None
    x = x_ref[...].astype(jnp.float32)          # (K, tile_n): N on lanes
    lv = lv_ref[...].astype(jnp.float32)
    term = _coral_term(x, lv)
    if w_ref is not None:
        term = term * w_ref[...].astype(jnp.float32)   # (K, 1) lane-broadcast
    out_ref[...] = -jnp.sum(term, axis=0, keepdims=True)  # (1, tile_n), dense


# ---------------------------------------------------------------------------
# Wrappers around pallas_call
# ---------------------------------------------------------------------------
def _row_loss(logits, levels, w, lane_block=None):
    n, k = logits.shape
    if lane_block is None:
        # Keep each (K, tile_n) f32 input buffer around <= 1 MiB.
        t = max(1, min(32, (1 << 20) // max(1, 4 * k * _LANES)))
        lane_block = t * _LANES
    elif lane_block % _LANES != 0 or lane_block <= 0:
        raise ValueError("lane_block must be a positive multiple of 128")

    # Transposed (K, N) layout: one extra HBM pass, but the kernel then runs
    # lane-dense (vs ~K/128 lane utilization) with unmasked output stores.
    xt = jnp.transpose(logits)
    lvt = jnp.transpose(levels)

    if n <= lane_block:
        tile_n, grid = n, 1
    else:
        tile_n, grid = lane_block, pl.cdiv(n, lane_block)

    has_w = w is not None
    args = [xt, lvt]
    in_specs = [pl.BlockSpec((k, tile_n), lambda i: (0, i)),
                pl.BlockSpec((k, tile_n), lambda i: (0, i))]
    if has_w:
        args.append(w.reshape(k, 1))
        in_specs.append(pl.BlockSpec((k, 1), lambda i: (0, 0)))

    kernel = functools.partial(_rowloss_kernel, has_w=has_w)
    cost = pl.CostEstimate(flops=(9 if has_w else 8) * n * k,
                           transcendentals=2 * n * k,
                           bytes_accessed=2 * 4 * n * k + 4 * n + 4 * k)

    out = pl.pallas_call(
        kernel,
        out_shape=jax.ShapeDtypeStruct((1, n), jnp.float32),
        grid=(grid,),
        in_specs=in_specs,
        out_specs=pl.BlockSpec((1, tile_n), lambda i: (0, i)),
        compiler_params=pltpu.CompilerParams(dimension_semantics=("parallel",)),
        cost_estimate=cost,
    )(*args)
    return out[0]


def _scalar_loss(logits, levels, w, reduction, block_rows, lane_block):
    n, k = logits.shape
    n_valid = n * k
    scale = (1.0 / n) if reduction == "mean" else 1.0
    rows = pl.cdiv(n_valid, _LANES)

    # --- choose the row tile --------------------------------------------------
    unit = 8
    if w is not None:
        q = k // math.gcd(k, _LANES)
        unit = (8 * q) // math.gcd(8, q)          # lcm(8, q): makes 128*tile % k == 0
    rows8 = pl.cdiv(rows, 8) * 8
    if rows8 <= max(block_rows, 8):
        tile_rows, grid = rows8, 1                # whole problem in one tile
    elif unit <= block_rows:
        tile_rows = (block_rows // unit) * unit
        grid = pl.cdiv(rows, tile_rows)
    else:
        # Pathological K: a repeating resident weight tile would blow the VMEM
        # budget -> fall back to the lane-dense transposed per-row kernel.
        vals = _row_loss(logits, levels, w, lane_block)
        return jnp.mean(vals) if reduction == "mean" else jnp.sum(vals)
    need_mask = (grid * tile_rows) != rows        # OOB rows only in last tile

    # --- lane-dense (rows, 128) view of the inputs -----------------------------
    x = logits.reshape(-1)
    lv = levels.reshape(-1)
    pad = rows * _LANES - n_valid
    if pad:
        # Ragged case only (<128 elems): zero-contribution constants keep the
        # kernel mask-free for the tail.  (jnp.pad costs one extra HBM pass;
        # when N*K % 128 == 0 the reshape below is a free bitcast.)
        x = jnp.pad(x, (0, pad), constant_values=_PAD_LOGIT)
        lv = jnp.pad(lv, (0, pad), constant_values=_PAD_LEVEL)
    x = x.reshape(rows, _LANES)
    lv = lv.reshape(rows, _LANES)

    args = [x, lv]
    in_specs = [pl.BlockSpec((tile_rows, _LANES), lambda i: (i, 0)),
                pl.BlockSpec((tile_rows, _LANES), lambda i: (i, 0))]
    w_tile = None
    if w is not None:
        # Element (r, c) of tile i has flat index i*tile_rows*128 + r*128 + c;
        # tile_rows*128 % K == 0 (or grid == 1), so w[flat % K] is the same for
        # every tile -> one resident tile, DMA'd once (index_map -> (0, 0)).
        idx = jnp.arange(tile_rows * _LANES, dtype=jnp.int32) % k
        w_tile = w[idx].reshape(tile_rows, _LANES)
        args.append(w_tile)
        in_specs.append(pl.BlockSpec((tile_rows, _LANES), lambda i: (0, 0)))

    kernel = functools.partial(
        _flat_partial_kernel, rows=rows, tile_rows=tile_rows,
        need_mask=need_mask, has_w=w is not None)

    in_bytes = (x.size * x.dtype.itemsize + lv.size * lv.dtype.itemsize
                + (w_tile.size * 4 if w_tile is not None else 0))
    cost = pl.CostEstimate(flops=(9 if w is not None else 8) * n_valid,
                           transcendentals=2 * n_valid,
                           bytes_accessed=in_bytes + grid * 8 * _LANES * 4)

    partials = pl.pallas_call(
        kernel,
        out_shape=jax.ShapeDtypeStruct((grid * 8, _LANES), jnp.float32),
        grid=(grid,),
        in_specs=in_specs,
        out_specs=pl.BlockSpec((8, _LANES), lambda i: (i, 0)),
        compiler_params=pltpu.CompilerParams(dimension_semantics=("parallel",)),
        cost_estimate=cost,
    )(*args)
    # Tiny finishing reduction; keeping the grid axis "parallel" (no resident
    # accumulator) lets both v7x TensorCores share the heavy kernel.
    return -jnp.sum(partials) * scale


def coral_loss_pallas(logits, levels, importance_weights=None, reduction="mean",
                      block_rows=_DEFAULT_BLOCK_ROWS, lane_block=None):
    """Pallas equivalent of coral_pytorch's coral_loss / CoralLoss.forward."""
    logits = jnp.asarray(logits)
    levels = jnp.asarray(levels)
    if logits.shape != levels.shape:
        raise ValueError(
            "Please ensure that logits (%s) has the same shape as levels (%s)."
            % (logits.shape, levels.shape))
    if reduction not in ("mean", "sum", None):
        raise ValueError(
            'Invalid value for `reduction`. Should be "mean", "sum", or None. '
            "Got %s" % reduction)
    if logits.ndim != 2:
        raise ValueError("logits/levels must be 2-D (num_examples, num_classes-1)")
    if block_rows % 8 != 0 or block_rows <= 0:
        raise ValueError("block_rows must be a positive multiple of 8")

    n, k = logits.shape
    w = None
    if importance_weights is not None:
        w = jnp.asarray(importance_weights, dtype=jnp.float32).reshape(-1)
        if w.shape[0] != k:
            raise ValueError("importance_weights must have shape (num_classes-1,)")

    if reduction is None:
        return _row_loss(logits, levels, w, lane_block)
    return _scalar_loss(logits, levels, w, reduction, block_rows, lane_block)


class CoralLoss:
    """JAX/Pallas port of the PyTorch CoralLoss module (forward only)."""

    def __init__(self, reduction="mean"):
        self.reduction = reduction

    def __call__(self, logits, levels, importance_weights=None):
        return coral_loss_pallas(
            logits, levels, importance_weights=importance_weights,
            reduction=self.reduction)


# ---------------------------------------------------------------------------
# Pure-JAX reference (mirrors the PyTorch code) for correctness checking.
# ---------------------------------------------------------------------------
def _coral_loss_ref(logits, levels, importance_weights=None, reduction="mean"):
    ls = jax.nn.log_sigmoid(logits)
    term1 = ls * levels + (ls - logits) * (1.0 - levels)
    if importance_weights is not None:
        term1 = term1 * importance_weights
    val = -jnp.sum(term1, axis=1)
    if reduction == "mean":
        return jnp.mean(val)
    elif reduction == "sum":
        return jnp.sum(val)
    return val


if __name__ == "__main__":
    import numpy as np

    # --- docstring example ----------------------------------------------------
    levels_ex = jnp.array(
        [[1.0, 1.0, 0.0, 0.0],
         [1.0, 0.0, 0.0, 0.0],
         [1.0, 1.0, 1.0, 1.0]], dtype=jnp.float32)
    logits_ex = jnp.array(
        [[2.1, 1.8, -2.1, -1.8],
         [1.9, -1.0, -1.5, -1.3],
         [1.9, 1.8, 1.7, 1.6]], dtype=jnp.float32)
    loss_fn = CoralLoss(reduction="mean")
    out_ex = jax.block_until_ready(loss_fn(logits_ex, levels_ex))
    np.testing.assert_allclose(np.asarray(out_ex), 0.6920, atol=1e-3)

    key = jax.random.PRNGKey(0)
    k1, k2, k3 = jax.random.split(key, 3)
    kcls = 7
    iw = jax.random.uniform(k3, (kcls,), dtype=jnp.float32) + 0.5

    def make(n):
        lg = jax.random.normal(k1, (n, kcls), dtype=jnp.float32) * 2.0
        lb = jax.random.randint(k2, (n,), 0, kcls + 1)
        lv = (jnp.arange(kcls)[None, :] < lb[:, None]).astype(jnp.float32)
        return lg, lv

    # --- small case: single-tile flat path + transposed row path --------------
    logits, levels = make(8)
    for reduction in ("mean", "sum", None):
        for weights in (None, iw):
            got = jax.block_until_ready(coral_loss_pallas(
                logits, levels, importance_weights=weights, reduction=reduction))
            want = _coral_loss_ref(logits, levels, weights, reduction)
            np.testing.assert_allclose(np.asarray(got), np.asarray(want),
                                       rtol=1e-5, atol=1e-5)

    # --- ragged case + tiny block_rows: multi-tile unweighted flat path with
    #     last-tile mask, and weighted fallback via the transposed row kernel --
    logits2, levels2 = make(172)
    for reduction in ("mean", "sum", None):
        for weights in (None, iw):
            got = jax.block_until_ready(coral_loss_pallas(
                logits2, levels2, importance_weights=weights,
                reduction=reduction, block_rows=8))
            want = _coral_loss_ref(logits2, levels2, weights, reduction)
            np.testing.assert_allclose(np.asarray(got), np.asarray(want),
                                       rtol=2e-5, atol=1e-4)

    # --- larger ragged case: multi-tile weighted flat path (resident weight
    #     tile, tile_rows = lcm(8, K)) and multi-block transposed row path -----
    logits3, levels3 = make(1500)
    for reduction in ("mean", "sum", None):
        for weights in (None, iw):
            got = jax.block_until_ready(coral_loss_pallas(
                logits3, levels3, importance_weights=weights,
                reduction=reduction, block_rows=64, lane_block=256))
            want = _coral_loss_ref(logits3, levels3, weights, reduction)
            np.testing.assert_allclose(np.asarray(got), np.asarray(want),
                                       rtol=2e-5, atol=1e-4)

    print("KERNEL_OK")
</pallas_src>

<mosaic_0001>
module attributes {stable_mosaic.version = 11 : i64} {
  func.func @_flat_partial_kernel(%arg0: i32, %arg1: memref<8x128xf32, #tpu.memory_space<vmem>>, %arg2: memref<8x128xf32, #tpu.memory_space<vmem>>, %arg3: memref<8x128xf32, #tpu.memory_space<vmem>>) attributes {dimension_semantics = [#tpu.dimension_semantics<parallel>], iteration_bounds = array<i64: 1>, scalar_prefetch = 0 : i64, scratch_operands = 0 : i64, tpu.core_type = #tpu.core_type<tc>, window_params = [{transform_indices = @transform_0, window_bounds = array<i64: 8, 128>}, {transform_indices = @transform_1, window_bounds = array<i64: 8, 128>}, {transform_indices = @transform_2, window_bounds = array<i64: 8, 128>}]} {
    %c0 = arith.constant 0 : index
    %c0_0 = arith.constant 0 : index
    %0 = vector.load %arg1[%c0, %c0_0] : memref<8x128xf32, #tpu.memory_space<vmem>>, vector<8x128xf32>
    %c0_1 = arith.constant 0 : index
    %c0_2 = arith.constant 0 : index
    %1 = vector.load %arg2[%c0_1, %c0_2] : memref<8x128xf32, #tpu.memory_space<vmem>>, vector<8x128xf32>
    %cst = arith.constant 0.000000e+00 : f32
    %2 = vector.broadcast %cst : f32 to vector<8x128xf32>
    %3 = arith.minimumf %0, %2 : vector<8x128xf32>
    %4 = math.absf %0 : vector<8x128xf32>
    %cst_3 = arith.constant 0.000000e+00 : f32
    %5 = vector.broadcast %cst_3 : f32 to vector<8x128xf32>
    %6 = arith.subf %5, %4 : vector<8x128xf32>
    %7 = math.exp %6 : vector<8x128xf32>
    %8 = math.log1p %7 : vector<8x128xf32>
    %9 = arith.subf %3, %8 : vector<8x128xf32>
    %cst_4 = arith.constant 1.000000e+00 : f32
    %10 = vector.broadcast %cst_4 : f32 to vector<8x128xf32>
    %11 = arith.subf %10, %1 : vector<8x128xf32>
    %12 = arith.mulf %0, %11 : vector<8x128xf32>
    %13 = arith.subf %9, %12 : vector<8x128xf32>
    %c0_i32 = arith.constant 0 : i32
    %14 = arith.cmpi eq, %arg0, %c0_i32 : i32
    %15 = arith.extui %14 : i1 to i32
    %c0_i32_5 = arith.constant 0 : i32
    %16 = arith.cmpi ne, %15, %c0_i32_5 : i32
    scf.if %16 {
      %20 = tpu.iota {dimensions = array<i32: 0>} : vector<8x128xi32>
      %c8_i32 = arith.constant 8 : i32
      %21 = arith.muli %arg0, %c8_i32 : i32
      %22 = vector.broadcast %21 : i32 to vector<8x128xi32>
      %23 = arith.addi %20, %22 : vector<8x128xi32>
      %c1_i32 = arith.constant 1 : i32
      %24 = vector.broadcast %c1_i32 : i32 to vector<8x128xi32>
      %25 = arith.cmpi slt, %23, %24 : vector<8x128xi32>
      %cst_7 = arith.constant 0.000000e+00 : f32
      %26 = vector.broadcast %cst_7 : f32 to vector<8x128xf32>
      %27 = arith.select %25, %13, %26 : vector<8x128xi1>, vector<8x128xf32>
      %28 = vector.shape_cast %27 : vector<8x128xf32> to vector<1x8x128xf32>
      %cst_8 = arith.constant dense<0.000000e+00> : vector<8x128xf32>
      %29 = vector.multi_reduction <add>, %28, %cst_8 [0] : vector<1x8x128xf32> to vector<8x128xf32>
      %c0_9 = arith.constant 0 : index
      %c0_10 = arith.constant 0 : index
      %30 = vector.load %arg3[%c0_9, %c0_10] : memref<8x128xf32, #tpu.memory_space<vmem>>, vector<8x128xf32>
      tpu.vector_store %arg3[%c0_9, %c0_10], %29 {strides = array<i32>} : memref<8x128xf32, #tpu.memory_space<vmem>>, vector<8x128xf32>,
    } else {
    }
    %true = arith.constant true
    %17 = arith.xori %14, %true : i1
    %18 = arith.extui %17 : i1 to i32
    %c0_i32_6 = arith.constant 0 : i32
    %19 = arith.cmpi ne, %18, %c0_i32_6 : i32
    scf.if %19 {
      %20 = vector.shape_cast %13 : vector<8x128xf32> to vector<1x8x128xf32>
      %cst_7 = arith.constant dense<0.000000e+00> : vector<8x128xf32>
      %21 = vector.multi_reduction <add>, %20, %cst_7 [0] : vector<1x8x128xf32> to vector<8x128xf32>
      %c0_8 = arith.constant 0 : index
      %c0_9 = arith.constant 0 : index
      %22 = vector.load %arg3[%c0_8, %c0_9] : memref<8x128xf32, #tpu.memory_space<vmem>>, vector<8x128xf32>
      tpu.vector_store %arg3[%c0_8, %c0_9], %21 {strides = array<i32>} : memref<8x128xf32, #tpu.memory_space<vmem>>, vector<8x128xf32>,
    } else {
    }
    return
  }
  func.func @transform_0(%arg0: i32) -> (i32, i32) {
    %c0_i32 = arith.constant 0 : i32
    %c0_i32_0 = arith.constant 0 : i32
    return %arg0, %c0_i32 : i32, i32
  }
  func.func @transform_1(%arg0: i32) -> (i32, i32) {
    %c0_i32 = arith.constant 0 : i32
    %c0_i32_0 = arith.constant 0 : i32
    return %arg0, %c0_i32 : i32, i32
  }
  func.func @transform_2(%arg0: i32) -> (i32, i32) {
    %c0_i32 = arith.constant 0 : i32
    %c0_i32_0 = arith.constant 0 : i32
    return %arg0, %c0_i32 : i32, i32
  }
}

</mosaic_0001>

<bundles_post_ra>
// kernel: tpu_custom_call.1
= control target key start
LH: loop header
LB: loop body
LE: loop exit
PB: predicated region body
PF: predicated region fallthrough
CT: control target
= control target key end

     0   :  { %7 = vsyncpa [#allocation3], 0  ;;  %s160_s0 = inlined_call_operand.hbm [shape: f32[1,128], index: 0, kind: input, shape index: {}]   ;;  %s161_s1 = inlined_call_operand.vmem [shape: f32[1,128], index: 1, kind: input, shape index: {}]   ;;  %s162_s2 = inlined_call_operand.hbm [shape: f32[8,128], index: 2, kind: output, shape index: {}]  }
   0x1   :  { %8 = vsyncpa [#allocation4], 0 }
   0x2   :  { %13 = vsyncadd [#allocation3], 112  ;;  %s132_s9 = smov [#allocation2]  }
   0x3   :  { %s14_s10 = sshll.u32 %s132_s9, 4  ;;  %s15_s10 = int_to_ptr.vmem [resolvable:$true] %s14_s10 }
   0x4   :  { %s96_s11 = scalar_lea.vmem %s15_s10, 16  ;;  %s100_s12 = scalar_lea.vmem %s15_s10, 128 }
   0x5   :  { %p97_p0 = scmp.ne.s32.totalorder %s15_s10, %s96_s11  ;;  %p101_p1 = scmp.lt.s32.totalorder %s15_s10, %s15_s10 }
   0x6   :  { %p102_p2 = scmp.lt.s32.totalorder %s100_s12, %s96_s11 }
   0x8   :  { %p103_p3 = por %p102_p2, %p101_p1 }
   0xa   :  { %p104_p4 = pnand %p103_p3, %p97_p0 }
   0xc   :  { %107 = shalt.err (!%p104_p4)
}
   0xd   :  { %s133_s13 = smov 16   ;;  %s134_s14 = smov 1  }
   0xe   :  { %20 = dma.hbm_to_vmem [thread:$0]  %s160_s0, 16, %s15_s10, [#allocation3], %s133_s13, %s133_s13, %s134_s14  }
   0xf   :  { %128 = dma.done.wait [#allocation3], 128  }
  0x10   :  { %129 = vsyncadd [#allocation3], 4294967168  ;;  %v26_v0 = vld [vmem:[#allocation2] sm:$0xff]  ;;  %v50_v10 = vlaneseq  ;;  %s135_s0 = smov [#allocation5]  }
  0x11   :  { %v29_v1 = vand.u32 2147483647, %v26_v0  ;;  %v27_v7 = vld [vmem:[%s161_s1] sm:$0xff]  ;;  %v28_v14 = vmin.f32 %v26_v0, 0.0  ;;  %s71_s19 = sshll.u32 %s135_s0, 4  ;;  %s72_s19 = int_to_ptr.vmem [resolvable:$true] %s71_s19 }
  0x12   :  { %v43_v11 = vsub.f32 1.0, %v27_v7  ;;  %v51_v16 = vshrl.u32 %v50_v10, 7  ;;  %s108_s1 = scalar_lea.vmem %s72_s19, 128  ;;  %p113_p6 = scmp.lt.s32.totalorder %s72_s19, %s72_s19 }
  0x13   :  { %v30_v2 = vsub.f32 0.0, %v29_v1  ;;  %p109_p5 = scmp.ne.s32.totalorder %s72_s19, %s108_s1  ;;  %p114_p7 = scmp.lt.s32.totalorder %s108_s1, %s108_s1 }
  0x14   :  { %v44_v17 = vmul.f32 %v43_v11, %v26_v0  ;;  %vm55_vm1 = vcmp.lt.s32.totalorder %v51_v16, 1 }
  0x15   :  { %v31_v3 = vmul.f32 1.442695, %v30_v2  ;;  %p115_p8 = por %p114_p7, %p113_p6 }
  0x17   :  { %84 = vpow2.f32 %v31_v3  ;;  %p116_p9 = pnand %p115_p8, %p109_p5 }
  0x24   :  { %v85_v4 = vpop.eup %84 }
  0x25   :  { %v33_v5 = vadd.f32 1.0, %v85_v4  ;;  %v36_v6 = vmul.f32 -0.5, %v85_v4  ;;  %v39_v9 = vand.u32 2147483647, %v85_v4 }
  0x27   :  { %86 = vlog2.f32 %v33_v5  ;;  %v37_v8 = vadd.f32 1.0, %v36_v6  ;;  %vm40_vm0 = vcmp.lt.f32.partialorder %v39_v9, 0.0004427343 }
  0x29   :  { %v38_v12 = vmul.f32 %v85_v4, %v37_v8 }
  0x34   :  { %v87_v13 = vpop.eup %86 }
  0x35   :  { %v35_v15 = vmul.f32 0.6931472, %v87_v13 }
  0x37   :  { %v41_v18 = vsel %vm40_vm0, %v38_v12, %v35_v15 }
  0x38   :  { %v42_v19 = vsub.f32 %v28_v14, %v41_v18 }
  0x3a   :  { %v45_v20 = vsub.f32 %v42_v19, %v44_v17 }
  0x3c   :  { %v56_v21 = vsel %vm55_vm1, %v45_v20, 0.0 }
  0x3d   :  { %58 = vst [vmem:[#allocation5] sm:$0xff] %v56_v21 }
  0x3e   :  { %119 = shalt.err (!%p116_p9)
}
  0x3f   :  { %74 = dma.vmem_to_hbm [thread:$0]  %s72_s19, 128, %s162_s2, [#allocation4]  }
  0x40   :  { %130 = dma.done.wait [#allocation4], 128  }
  0x41   :  { %131 = vsyncadd [#allocation4], 4294967168 }
  0x42   :  { %78 = vsyncpa [#allocation3], 1 }
  0x43   :  { %79 = vsyncpa [#allocation4], 1 }

</bundles_post_ra>
